<compile_context>
chip_gen: v6e
topology: v6e:2x2x1
jax: 0.10.0
libtpu: 0.0.40
codegen_flags: <defaults>
</compile_context>

<pallas_src>
import jax
import jax.numpy as jnp
from jax.experimental import pallas as pl
from jax.experimental.pallas import tpu as pltpu


def _patch_unembed_kernel(x_ref, o_ref):
    """One (batch-block, hw-tile) grid step.

    x_ref : (Bt, tile_hw, C)  token-major input slice
    o_ref : (Bt, C, tile_hw)  channel-major (lane-dense) output slice
    """
    # Pure relayout: per-batch XLU transpose (tile_hw, C) -> (C, tile_hw).
    # Stores are unmasked full-vreg vst because tile_hw is lane-dense.
    o_ref[...] = jnp.transpose(x_ref[...], (0, 2, 1))


def patch_unembed_forward(x, x_size, embed_dim):
    """Pallas implementation of PatchUnEmbed.forward.

    x        : (B, HW, C) with C == embed_dim and HW == H * W
    x_size   : (H, W)
    returns  : (B, embed_dim, H, W)
    """
    B, HW, C = x.shape
    H, W = x_size
    assert C == embed_dim, "channel dim must equal embed_dim"
    assert HW == H * W, "sequence length must equal H*W"

    itemsize = jnp.dtype(x.dtype).itemsize

    # ---- budget-driven tiling -------------------------------------------
    # Requested scoped-VMEM limit: 32 MiB works on all of v5e/v6e/v7x (and is
    # well under v7x's 64 MiB physical VMEM).
    vmem_limit_bytes = 32 * 1024 * 1024
    # Input + output tiles, each double-buffered -> ~4x the per-tile bytes.
    # Keep ~25% headroom below the requested limit.
    max_tile_bytes = (vmem_limit_bytes * 3 // 4) // 4

    if HW >= 128:
        # Largest lane-dense (multiple-of-128) HW tile that fits the budget,
        # never exceeding HW; a ragged last block is masked by Pallas, so no
        # full-extent fallback (and no VMEM-OOM hazard) is needed.
        budget_lanes = max_tile_bytes // max(C * itemsize, 1)
        tile_hw = min((budget_lanes // 128) * 128, (HW // 128) * 128)
        tile_hw = max(tile_hw, 128)
    else:
        # Tiny sequence: full-extent block (legal: block dim == array dim).
        tile_hw = HW
    grid_hw = pl.cdiv(HW, tile_hw)

    # Batch blocking: when a single-batch tile is tiny, move several batch
    # rows per step so each step carries >= ~2 MiB (amortizes the ~0.35us
    # per-step cost), still within the VMEM budget.
    per_b_bytes = tile_hw * C * itemsize
    target_step_bytes = 2 * 1024 * 1024
    bt = max(1, min(B, target_step_bytes // max(per_b_bytes, 1)))
    bt = min(bt, max(1, max_tile_bytes // max(per_b_bytes, 1)))
    # Keep >= 2 total grid steps when possible so both v7x TensorCores get a
    # shard of this purely bandwidth-bound kernel.
    if grid_hw == 1 and B > 1:
        bt = min(bt, max(1, B // 2))
    grid_b = pl.cdiv(B, bt)

    grid = (grid_b, grid_hw)

    out_flat = pl.pallas_call(
        _patch_unembed_kernel,
        out_shape=jax.ShapeDtypeStruct((B, C, HW), x.dtype),
        grid_spec=pltpu.PrefetchScalarGridSpec(
            num_scalar_prefetch=0,
            grid=grid,
            in_specs=[pl.BlockSpec((bt, tile_hw, C), lambda b, t: (b, t, 0))],
            out_specs=pl.BlockSpec((bt, C, tile_hw), lambda b, t: (b, 0, t)),
        ),
        compiler_params=pltpu.CompilerParams(
            dimension_semantics=("parallel", "parallel"),
            vmem_limit_bytes=vmem_limit_bytes,
        ),
        cost_estimate=pl.CostEstimate(
            flops=0,
            transcendentals=0,
            bytes_accessed=2 * B * HW * C * itemsize,
        ),
    )(x)

    # Metadata-only reshape of contiguous trailing dims (no HBM traffic).
    return out_flat.reshape(B, C, H, W)


def _reference_forward(x, x_size, embed_dim):
    """Pure-JAX reference matching the PyTorch module."""
    B, HW, C = x.shape
    return jnp.transpose(x, (0, 2, 1)).reshape(B, embed_dim, x_size[0], x_size[1])


if __name__ == "__main__":
    # Small deterministic setup consistent with the module:
    # batch=2, embed_dim=8, spatial 16x16 -> sequence length HW=256.
    B, embed_dim, H, W = 2, 8, 16, 16
    HW = H * W

    key = jax.random.PRNGKey(0)
    x = jax.random.normal(key, (B, HW, embed_dim), dtype=jnp.float32)

    out = jax.block_until_ready(patch_unembed_forward(x, (H, W), embed_dim))
    ref = jax.block_until_ready(_reference_forward(x, (H, W), embed_dim))

    assert out.shape == (B, embed_dim, H, W)
    assert jnp.allclose(out, ref, atol=0.0, rtol=0.0)
    print("KERNEL_OK")
</pallas_src>

<mosaic_0001>
module attributes {stable_mosaic.version = 11 : i64} {
  func.func @_patch_unembed_kernel(%arg0: i32, %arg1: i32, %arg2: memref<1x256x8xf32, #tpu.memory_space<vmem>>, %arg3: memref<1x8x256xf32, #tpu.memory_space<vmem>>) attributes {dimension_semantics = [#tpu.dimension_semantics<parallel>, #tpu.dimension_semantics<parallel>], iteration_bounds = array<i64: 2, 1>, scalar_prefetch = 0 : i64, scratch_operands = 0 : i64, tpu.core_type = #tpu.core_type<tc>, window_params = [{transform_indices = @transform_0, window_bounds = array<i64: 1, 256, 8>}, {transform_indices = @transform_1, window_bounds = array<i64: 1, 8, 256>}]} {
    %c0 = arith.constant 0 : index
    %c0_0 = arith.constant 0 : index
    %c0_1 = arith.constant 0 : index
    %0 = vector.load %arg2[%c0, %c0_0, %c0_1] : memref<1x256x8xf32, #tpu.memory_space<vmem>>, vector<1x256x8xf32>
    %1 = tpu.transpose %0, [0, 2, 1] : vector<1x256x8xf32> -> vector<1x8x256xf32>
    %c0_2 = arith.constant 0 : index
    %c0_3 = arith.constant 0 : index
    %c0_4 = arith.constant 0 : index
    %2 = vector.load %arg3[%c0_2, %c0_3, %c0_4] : memref<1x8x256xf32, #tpu.memory_space<vmem>>, vector<1x8x256xf32>
    tpu.vector_store %arg3[%c0_2, %c0_3, %c0_4], %1 {strides = array<i32>} : memref<1x8x256xf32, #tpu.memory_space<vmem>>, vector<1x8x256xf32>,
    return
  }
  func.func @transform_0(%arg0: i32, %arg1: i32) -> (i32, i32, i32) {
    %c0_i32 = arith.constant 0 : i32
    %c0_i32_0 = arith.constant 0 : i32
    return %arg0, %arg1, %c0_i32 : i32, i32, i32
  }
  func.func @transform_1(%arg0: i32, %arg1: i32) -> (i32, i32, i32) {
    %c0_i32 = arith.constant 0 : i32
    %c0_i32_0 = arith.constant 0 : i32
    return %arg0, %c0_i32, %arg1 : i32, i32, i32
  }
}

</mosaic_0001>

<bundles_post_ra>
// kernel: tpu_custom_call.1
= control target key start
LH: loop header
LB: loop body
LE: loop exit
PB: predicated region body
PF: predicated region fallthrough
CT: control target
= control target key end

     0   :  { %6 = vsyncpa [#allocation3], 0  ;;  %s641_s0 = inlined_call_operand.vmem [shape: f32[2,256,8], index: 0, kind: input, shape index: {}]   ;;  %s642_s1 = inlined_call_operand.hbm [shape: f32[2,8,256], index: 1, kind: output, shape index: {}]  }
   0x1   :  { %8 = vsyncpa [#allocation3 + $0x1], 0  ;;  %s496_s6 = smov 0   ;;  %s498_s7 = smov 0  }
   0x2   :  { %s500_s8 = smov 0   ;;  %s502_s9 = smov 0  }
   0x3   :  { %s504_s10 = smov 0   ;;  %s506_s11 = smov 0  }
   0x4 LB: > { %s337_s12 = sadd.s32 4294967295, %s483_s11   ;;  %s338_s13 = sadd.s32 4294967294, %s483_s11   ;;  %s483_s11 = sphi %s506_s11, %s14_s11   ;;  %s479_s10 = sphi %s504_s10, %s649_s10   ;;  %s475_s9 = sphi %s502_s9, %s648_s9   ;;  %s471_s8 = sphi %s500_s8, %s647_s8   ;;  %s467_s7 = sphi %s498_s7, %s646_s7   ;;  %s463_s6 = sphi %s496_s6, %s645_s6  }
   0x5   : > { %s26_s14 = sadd.s32 1, %s479_s10  ;;  %s63_s15 = sadd.s32 1, %s471_s8 }
   0x6   : > { %p28_p0 = scmp.ge.s32.totalorder %s26_s14, 2  ;;  %p73_p1 = scmp.ne.s32.totalorder %s471_s8, %s467_s7 }
   0x7   : > { %p74_p2 = scmp.eq.s32.totalorder %s337_s12, 1  ;;  %p79_p3 = scmp.ne.s32.totalorder %s467_s7, %s463_s6 }
   0x8   : > { %s651_s14 = smov (%p28_p0, %s26_s14), 0  ;;  %p80_p5 = scmp.eq.s32.totalorder %s338_s13, 1 }
   0x9   : > { %p536_p4 = por %p74_p2, %p73_p1  ;;  %s58_s17 = ssub.s32 %s479_s10, %s651_s14 }
   0xa   : > { %p341_p6 = scmp.ge.s32.totalorder %s483_s11, 1  ;;  %p61_p7 = scmp.eq.s32.totalorder %s58_s17, 0 }
   0xb   : > { %p543_p8 = por %p80_p5, %p79_p3  ;;  %p111_p9 = scmp.lt.s32.totalorder %s483_s11, 3 }
   0xc   : > { %s549_s19 = scalar_select %p61_p7, %s471_s8, %s63_s15  }
   0xd   : > { %p112_p10 = pnand %p341_p6, %p111_p9 }
   0xe   : > { %p136_p11 = scmp.lt.s32.totalorder (!%p112_p10), %s475_s9, 1  ;;  %s132_s25 = sand.u32 (!%p112_p10), 1, %s467_s7  }
   0xf   : > { %115 = sbr.rel (%p112_p10) target bundleno = 164 (0xa4), region = 24  ;;  %s342_s26 = sshll.u32 (!%p112_p10), %s132_s25, 4 }
  0x10   : > { %s134_s27 = scalar_lea.vmem (!%p112_p10), [#allocation2], %s342_s26  ;;  %s351_s29 = sshll.u32 (!%p112_p10), %s475_s9, 8 }
  0x11   : > { %s261_s28 = sshll.u32 (!%p112_p10), %s134_s27, 4  ;;  %s597_s3 = scalar_lea.hbm (!%p112_p10), %s642_s1, %s351_s29  ;;  %s592_s28 = int_to_ptr.vmem [resolvable:$true] %s261_s28 }
  0x12   : > { %s245_s4 = scalar_lea.sflag (!%p112_p10), [#allocation3], %s132_s25  ;;  %s407_s5 = scalar_lea.vmem (!%p112_p10), %s592_s28, 256 }
  0x13   : > { %p408_p12 = scmp.ne.s32.totalorder (!%p112_p10), %s592_s28, %s407_s5 }
  0x14   : > { %s137_s20 = scalar_select %p136_p11, %s475_s9, 1 }
  0x15   : > { %p409_p13 = pnand %p408_p12, %p536_p4  ;;  %s485_s9 = smov [#allocation2]  }
  0x16   : > { %s350_s21 = sshll.u32 %s137_s20, 8  ;;  %s411_s12 = sshll.u32 %s485_s9, 4  ;;  %s412_s12 = int_to_ptr.vmem [resolvable:$false] %s411_s12 }
  0x17   : > { %s556_s24 = scalar_lea.vmem %s641_s0, %s350_s21  ;;  %p410_p0 = pneg %p409_p13 }
  0x18   : > { %v162_v0 = vld [vmem:[%s556_s24 + $0x80] sm:$0xff]  ;;  %v163_v2 = vld [vmem:[%s556_s24 + $0x88] sm:$0xff]  ;;  %v164_v4 = vld [vmem:[%s556_s24 + $0x90] sm:$0xff]  ;;  %s413_s13 = scalar_lea.vmem %s412_s12, 512  ;;  %p414_p1 = scmp.lt.s32.totalorder %s592_s28, %s412_s12 }
  0x19   : > { %v146_v1 = vld [vmem:[%s556_s24] sm:$0xff]  ;;  %210 = vxpose.xlu1.b32.start [1/16] (narrow) %v162_v0, 8  ;;  %v147_v3 = vld [vmem:[%s556_s24 + $0x8] sm:$0xff]  ;;  %v148_v5 = vld [vmem:[%s556_s24 + $0x10] sm:$0xff]  ;;  %p415_p2 = scmp.lt.s32.totalorder %s413_s13, %s407_s5 }
  0x1a   : > { %178 = vxpose.xlu0.b32.start [1/16] (narrow) %v146_v1, 8  ;;  %v165_v6 = vld [vmem:[%s556_s24 + $0x98] sm:$0xff]  ;;  %v166_v8 = vld [vmem:[%s556_s24 + $0xa0] sm:$0xff]  ;;  %v167_v10 = vld [vmem:[%s556_s24 + $0xa8] sm:$0xff] }
  0x1b   : > { %v149_v7 = vld [vmem:[%s556_s24 + $0x18] sm:$0xff]  ;;  %v150_v9 = vld [vmem:[%s556_s24 + $0x20] sm:$0xff]  ;;  %v151_v11 = vld [vmem:[%s556_s24 + $0x28] sm:$0xff]  ;;  %p416_p3 = por %p415_p2, %p414_p1 }
  0x1c   : > { %v168_v12 = vld [vmem:[%s556_s24 + $0xb0] sm:$0xff]  ;;  %v169_v14 = vld [vmem:[%s556_s24 + $0xb8] sm:$0xff]  ;;  %v170_v16 = vld [vmem:[%s556_s24 + $0xc0] sm:$0xff] }
  0x1d   : > { %211 = vxpose.xlu1.b32.cont [2/16] (narrow) %v163_v2, 8  ;;  %v152_v13 = vld [vmem:[%s556_s24 + $0x30] sm:$0xff]  ;;  %v153_v15 = vld [vmem:[%s556_s24 + $0x38] sm:$0xff]  ;;  %v154_v17 = vld [vmem:[%s556_s24 + $0x40] sm:$0xff]  ;;  %p417_p5 = pnand %p416_p3, %p410_p0 }
  0x1e   : > { %179 = vxpose.xlu0.b32.cont [2/16] (narrow) %v147_v3, 8  ;;  %v171_v18 = vld [vmem:[%s556_s24 + $0xc8] sm:$0xff]  ;;  %v172_v20 = vld [vmem:[%s556_s24 + $0xd0] sm:$0xff]  ;;  %v173_v22 = vld [vmem:[%s556_s24 + $0xd8] sm:$0xff] }
  0x1f   : > { %v155_v19 = vld [vmem:[%s556_s24 + $0x48] sm:$0xff]  ;;  %v156_v21 = vld [vmem:[%s556_s24 + $0x50] sm:$0xff]  ;;  %v157_v23 = vld [vmem:[%s556_s24 + $0x58] sm:$0xff] }
  0x20   : > { %v174_v24 = vld [vmem:[%s556_s24 + $0xe0] sm:$0xff]  ;;  %v175_v26 = vld [vmem:[%s556_s24 + $0xe8] sm:$0xff]  ;;  %v176_v28 = vld [vmem:[%s556_s24 + $0xf0] sm:$0xff] }
  0x21   : > { %212 = vxpose.xlu1.b32.cont [3/16] (narrow) %v164_v4, 8  ;;  %v158_v25 = vld [vmem:[%s556_s24 + $0x60] sm:$0xff]  ;;  %v159_v27 = vld [vmem:[%s556_s24 + $0x68] sm:$0xff]  ;;  %v160_v29 = vld [vmem:[%s556_s24 + $0x70] sm:$0xff] }
  0x22   : > { %180 = vxpose.xlu0.b32.cont [3/16] (narrow) %v148_v5, 8  ;;  %v177_v30 = vld [vmem:[%s556_s24 + $0xf8] sm:$0xff] }
  0x23   : > { %v161_v31 = vld [vmem:[%s556_s24 + $0x78] sm:$0xff] }
  0x25   : > { %213 = vxpose.xlu1.b32.cont [4/16] (narrow) %v165_v6, 8 }
  0x26   : > { %181 = vxpose.xlu0.b32.cont [4/16] (narrow) %v149_v7, 8 }
  0x29   : > { %214 = vxpose.xlu1.b32.cont [5/16] (narrow) %v166_v8, 8 }
  0x2a   : > { %182 = vxpose.xlu0.b32.cont [5/16] (narrow) %v150_v9, 8 }
  0x2d   : > { %215 = vxpose.xlu1.b32.cont [6/16] (narrow) %v167_v10, 8 }
  0x2e   : > { %183 = vxpose.xlu0.b32.cont [6/16] (narrow) %v151_v11, 8 }
  0x31   : > { %216 = vxpose.xlu1.b32.cont [7/16] (narrow) %v168_v12, 8 }
  0x32   : > { %184 = vxpose.xlu0.b32.cont [7/16] (narrow) %v152_v13, 8 }
  0x35   : > { %217 = vxpose.xlu1.b32.cont [8/16] (narrow) %v169_v14, 8 }
  0x36   : > { %185 = vxpose.xlu0.b32.cont [8/16] (narrow) %v153_v15, 8 }
  0x39   : > { %218 = vxpose.xlu1.b32.cont [9/16] (narrow) %v170_v16, 8 }
  0x3a   : > { %186 = vxpose.xlu0.b32.cont [9/16] (narrow) %v154_v17, 8 }
  0x3d   : > { %219 = vxpose.xlu1.b32.cont [10/16] (narrow) %v171_v18, 8 }
  0x3e   : > { %187 = vxpose.xlu0.b32.cont [10/16] (narrow) %v155_v19, 8 }
  0x41   : > { %220 = vxpose.xlu1.b32.cont [11/16] (narrow) %v172_v20, 8 }
  0x42   : > { %188 = vxpose.xlu0.b32.cont [11/16] (narrow) %v156_v21, 8 }
  0x45   : > { %221 = vxpose.xlu1.b32.cont [12/16] (narrow) %v173_v22, 8 }
  0x46   : > { %189 = vxpose.xlu0.b32.cont [12/16] (narrow) %v157_v23, 8 }
  0x49   : > { %222 = vxpose.xlu1.b32.cont [13/16] (narrow) %v174_v24, 8 }
  0x4a   : > { %190 = vxpose.xlu0.b32.cont [13/16] (narrow) %v158_v25, 8 }
  0x4d   : > { %223 = vxpose.xlu1.b32.cont [14/16] (narrow) %v175_v26, 8 }
  0x4e   : > { %191 = vxpose.xlu0.b32.cont [14/16] (narrow) %v159_v27, 8 }
  0x51   : > { %224 = vxpose.xlu1.b32.cont [15/16] (narrow) %v176_v28, 8 }
  0x52   : > { %192 = vxpose.xlu0.b32.cont [15/16] (narrow) %v160_v29, 8 }
  0x55   : > { %225 = vxpose.xlu1.b32.end [16/16] (narrow) %v177_v30, 8 }
  0x56   : > { %193 = vxpose.xlu0.b32.end [16/16] (narrow) %v161_v31, 8 }
  0x95   : > { %v226_v32 = vpop.trf.xlu1 }
  0x96   : > { %v194_v33 = vpop.trf.xlu0  ;;  %243 = vst [vmem:[%s134_s27 + $0x8] sm:$0xff] %v226_v32 }
  0x97   : > { %242 = vst [vmem:[%s134_s27] sm:$0xff] %v194_v33 }
  0x98   : > { %420 = shalt.err (!%p417_p5)
}
  0x99   : > { %s421_s15 = scalar_lea.hbm %s597_s3, 256  ;;  %s425_s21 = scalar_lea.hbm %s642_s1, 512 }
  0x9a   : > { %p422_p6 = scmp.ne.s32.totalorder %s597_s3, %s421_s15  ;;  %p426_p10 = scmp.lt.s32.totalorder %s597_s3, %s642_s1 }
  0x9b   : > { %p427_p11 = scmp.lt.s32.totalorder %s425_s21, %s421_s15 }
  0x9c   : > { %p423_p7 = pnand %p422_p6, %p536_p4 }
  0x9d   : > { %p428_p12 = por %p427_p11, %p426_p10 }
  0x9e   : > { %p424_p9 = pneg %p423_p7 }
  0xa0   : > { %p429_p13 = pnand %p428_p12, %p424_p9 }
  0xa2   : > { %432 = shalt.err (!%p429_p13)
}
  0xa3   : > { %352 = dma.vmem_to_hbm [thread:$0]  (%p536_p4), %s592_s28, 256, %s597_s3, %s245_s4  }
  0xa4 PF: > { %p358_p0 = scmp.ge.s32.totalorder %s483_s11, 2  ;;  %s273_s24 = sand.u32 1, %s463_s6  }
  0xa5   : > { %s274_s25 = scalar_lea.sflag [#allocation3], %s273_s24 }
  0xa6   : > { %p355_p1 = pnand %p358_p0, %p543_p8 }
  0xa8   : > { %p356_p2 = pneg %p355_p1 }
  0xaa   : > { %458 = dma.done.wait (%p356_p2), %s274_s25, 256  }
  0xab   : > { %460 = vsyncadd (%p356_p2), %s274_s25, 4294967040  ;;  %s14_s11 = sadd.s32 1, %s483_s11   ;;  %s645_s6 = smov %s467_s7 }
  0xac   : > { %p11_p3 = scmp.ge.s32.totalorder %s14_s11, 4   ;;  %s646_s7 = smov %s471_s8 }
  0xad   : > { %s647_s8 = smov %s549_s19  ;;  %s648_s9 = smov %s479_s10 }
  0xae   : > { %s649_s10 = smov %s651_s14  ;;  %13 = sbr.rel (!%p11_p3) target bundleno = 4 (0x4), region = 59 }
  0xb3   :  { %279 = vsyncpa [#allocation3], 1 }
  0xb4   :  { %281 = vsyncpa [#allocation3 + $0x1], 1 }

</bundles_post_ra>
